<compile_context>
chip_gen: v5e
topology: v5e:2x2
jax: 0.10.0
libtpu: 0.0.40
codegen_flags: <defaults>
</compile_context>

<pallas_src>
import math

import jax
import jax.numpy as jnp
import numpy as np
from jax.experimental import pallas as pl
from jax.experimental.pallas import tpu as pltpu


# ----------------------------- Pallas kernel ------------------------------ #

def _mlp_kernel(x_ref, w1_ref, b1_ref, w2_ref, b2_ref, w3s_ref, bias_ref,
                o_ref):
    # Matmul operands in bf16 (single-pass MXU); accumulate + VPU/EUP in f32.
    x = x_ref[...].astype(jnp.bfloat16)                               # [TB, 9]
    h1 = jnp.tanh(
        jnp.dot(x, w1_ref[...], preferred_element_type=jnp.float32)
        + b1_ref[...])                                                # [TB, 50] f32
    h2 = jnp.tanh(
        jnp.dot(h1.astype(jnp.bfloat16), w2_ref[...],
                preferred_element_type=jnp.float32)
        + b2_ref[...])                                                # [TB, 50] f32
    # scale is already folded into w3s_ref on the host.
    y = (jnp.dot(h2.astype(jnp.bfloat16), w3s_ref[...],
                 preferred_element_type=jnp.float32)
         + bias_ref[...])                                             # [TB, 9] f32
    o_ref[...] = y.astype(o_ref.dtype)


def _round_up(n, m):
    return ((n + m - 1) // m) * m


def model_h2c_forward(x, params, *, tb_max=2048):
    """x: [B, 9] float32 -> [B, 9] float32."""
    B = x.shape[0]

    # Host-side parameter prep (off the hot path).
    w1t = params["w1sn"].T.astype(jnp.bfloat16)                  # [9, 50]
    w2t = params["w2sn"].T.astype(jnp.bfloat16)                  # [50, 50]
    # Fold the output scale into W3 so the kernel does no scalar multiply.
    w3t_scaled = (params["w3sn"] * params["scale"]).T.astype(jnp.bfloat16)  # [50, 9]
    b1 = params["b1"].reshape(1, -1).astype(jnp.float32)         # [1, 50]
    b2 = params["b2"].reshape(1, -1).astype(jnp.float32)         # [1, 50]
    bias = params["bias"].reshape(1, -1).astype(jnp.float32)     # [1, 9]

    # Batch tile: up to tb_max rows (multiple of 8).  Pad B to a tile multiple.
    tb = min(tb_max, _round_up(B, 8))
    b_pad = _round_up(B, tb)
    xp = x if b_pad == B else jnp.pad(x, ((0, b_pad - B), (0, 0)))
    grid = (b_pad // tb,)

    out = pl.pallas_call(
        _mlp_kernel,
        out_shape=jax.ShapeDtypeStruct((b_pad, 9), jnp.float32),
        grid=grid,
        in_specs=[
            pl.BlockSpec((tb, 9), lambda i: (i, 0)),     # x: batch-tiled
            pl.BlockSpec((9, 50), lambda i: (0, 0)),     # w1t: VMEM-resident
            pl.BlockSpec((1, 50), lambda i: (0, 0)),     # b1
            pl.BlockSpec((50, 50), lambda i: (0, 0)),    # w2t
            pl.BlockSpec((1, 50), lambda i: (0, 0)),     # b2
            pl.BlockSpec((50, 9), lambda i: (0, 0)),     # w3t * scale
            pl.BlockSpec((1, 9), lambda i: (0, 0)),      # bias
        ],
        out_specs=pl.BlockSpec((tb, 9), lambda i: (i, 0)),
        compiler_params=pltpu.CompilerParams(
            dimension_semantics=("parallel",)),          # megacore on v7x
    )(xp, w1t, b1, w2t, b2, w3t_scaled, bias)

    return out[:B] if b_pad != B else out


# ------------------------ Parameter initialization ------------------------ #

def _spectral_sigma(w, key, n_iters=16):
    """Power-iteration estimate of the spectral norm of w:[out, in]
    (mirrors torch spectral_norm: 15 iters at registration + 1 per forward)."""
    out_f, in_f = w.shape
    ku, kv = jax.random.split(key)
    u = jax.random.normal(ku, (out_f,), dtype=w.dtype)
    u = u / (jnp.linalg.norm(u) + 1e-12)
    v = jax.random.normal(kv, (in_f,), dtype=w.dtype)
    v = v / (jnp.linalg.norm(v) + 1e-12)
    for _ in range(n_iters):
        u = w @ v
        u = u / (jnp.linalg.norm(u) + 1e-12)
        v = w.T @ u
        v = v / (jnp.linalg.norm(v) + 1e-12)
    return u @ (w @ v)


def init_params(key):
    keys = jax.random.split(key, 10)

    def linear_init(kw, kb, out_f, in_f):
        bound = 1.0 / math.sqrt(in_f)
        w = jax.random.uniform(kw, (out_f, in_f), minval=-bound, maxval=bound,
                               dtype=jnp.float32)
        b = jax.random.uniform(kb, (out_f,), minval=-bound, maxval=bound,
                               dtype=jnp.float32)
        return w, b

    w1, b1 = linear_init(keys[0], keys[1], 50, 9)
    w2, b2 = linear_init(keys[2], keys[3], 50, 50)
    w3, _ = linear_init(keys[4], keys[5], 9, 50)   # Linear(50, 9, bias=False)

    sigma1 = _spectral_sigma(w1, keys[6])
    sigma2 = _spectral_sigma(w2, keys[7])
    sigma3 = _spectral_sigma(w3, keys[8])

    # self._bias: uniform(-1/sqrt(fan_in), 1/sqrt(fan_in)), fan_in of layer3 = 50
    bound3 = 1.0 / math.sqrt(50)
    bias = jax.random.uniform(keys[9], (9,), minval=-bound3, maxval=bound3,
                              dtype=jnp.float32)

    return {
        "w1sn": w1 / sigma1, "b1": b1,
        "w2sn": w2 / sigma2, "b2": b2,
        "w3sn": w3 / sigma3,
        "scale": sigma3,          # self._scale = Parameter(sigma) at init
        "bias": bias,
    }


# ------------------------------ References -------------------------------- #

def reference_forward_f32(x, p):
    h1 = jnp.tanh(x @ p["w1sn"].T + p["b1"])
    h2 = jnp.tanh(h1 @ p["w2sn"].T + p["b2"])
    return p["scale"] * (h2 @ p["w3sn"].T) + p["bias"]


def reference_forward_bf16(x, p):
    """Reference matching the kernel's bf16-operand / f32-accumulate math."""
    bf = jnp.bfloat16
    w1t = p["w1sn"].T.astype(bf)
    w2t = p["w2sn"].T.astype(bf)
    w3t = (p["w3sn"] * p["scale"]).T.astype(bf)
    h1 = jnp.tanh(jnp.dot(x.astype(bf), w1t,
                          preferred_element_type=jnp.float32) + p["b1"])
    h2 = jnp.tanh(jnp.dot(h1.astype(bf), w2t,
                          preferred_element_type=jnp.float32) + p["b2"])
    return jnp.dot(h2.astype(bf), w3t,
                   preferred_element_type=jnp.float32) + p["bias"]


# --------------------------------- Main ----------------------------------- #

if __name__ == "__main__":
    key = jax.random.PRNGKey(0)
    k_params, k_x1, k_x2 = jax.random.split(key, 3)

    params = init_params(k_params)

    # Small demo batch (single grid step).
    x = jax.random.normal(k_x1, (8, 9), dtype=jnp.float32)
    out = jax.block_until_ready(model_h2c_forward(x, params))
    assert out.shape == (8, 9)
    np.testing.assert_allclose(np.asarray(out),
                               np.asarray(reference_forward_bf16(x, params)),
                               rtol=1e-3, atol=1e-3)
    np.testing.assert_allclose(np.asarray(out),
                               np.asarray(reference_forward_f32(x, params)),
                               rtol=3e-2, atol=3e-2)

    # Exercise multi-tile grid + batch padding (B=20 with 8-row tiles -> 3 tiles).
    x2 = jax.random.normal(k_x2, (20, 9), dtype=jnp.float32)
    out2 = jax.block_until_ready(model_h2c_forward(x2, params, tb_max=8))
    assert out2.shape == (20, 9)
    np.testing.assert_allclose(np.asarray(out2),
                               np.asarray(reference_forward_bf16(x2, params)),
                               rtol=1e-3, atol=1e-3)

    print("KERNEL_OK")
</pallas_src>

<mosaic_0001>
module attributes {stable_mosaic.version = 11 : i64} {
  func.func @_mlp_kernel(%arg0: i32, %arg1: memref<8x9xf32, #tpu.memory_space<vmem>>, %arg2: memref<9x50xbf16, #tpu.memory_space<vmem>>, %arg3: memref<1x50xf32, #tpu.memory_space<vmem>>, %arg4: memref<50x50xbf16, #tpu.memory_space<vmem>>, %arg5: memref<1x50xf32, #tpu.memory_space<vmem>>, %arg6: memref<50x9xbf16, #tpu.memory_space<vmem>>, %arg7: memref<1x9xf32, #tpu.memory_space<vmem>>, %arg8: memref<8x9xf32, #tpu.memory_space<vmem>>) attributes {dimension_semantics = [#tpu.dimension_semantics<parallel>], iteration_bounds = array<i64: 1>, scalar_prefetch = 0 : i64, scratch_operands = 0 : i64, tpu.core_type = #tpu.core_type<tc>, window_params = [{transform_indices = @transform_0, window_bounds = array<i64: 8, 9>}, {pipeline_mode = #tpu.pipeline_mode<synchronous>, transform_indices = @transform_1, window_bounds = array<i64: 9, 50>}, {pipeline_mode = #tpu.pipeline_mode<synchronous>, transform_indices = @transform_2, window_bounds = array<i64: 1, 50>}, {pipeline_mode = #tpu.pipeline_mode<synchronous>, transform_indices = @transform_3, window_bounds = array<i64: 50, 50>}, {pipeline_mode = #tpu.pipeline_mode<synchronous>, transform_indices = @transform_4, window_bounds = array<i64: 1, 50>}, {pipeline_mode = #tpu.pipeline_mode<synchronous>, transform_indices = @transform_5, window_bounds = array<i64: 50, 9>}, {pipeline_mode = #tpu.pipeline_mode<synchronous>, transform_indices = @transform_6, window_bounds = array<i64: 1, 9>}, {transform_indices = @transform_7, window_bounds = array<i64: 8, 9>}]} {
    %c0 = arith.constant 0 : index
    %c0_0 = arith.constant 0 : index
    %0 = vector.load %arg1[%c0, %c0_0] : memref<8x9xf32, #tpu.memory_space<vmem>>, vector<8x9xf32>
    %1 = arith.truncf %0 : vector<8x9xf32> to vector<8x9xbf16>
    %c0_1 = arith.constant 0 : index
    %c0_2 = arith.constant 0 : index
    %2 = vector.load %arg2[%c0_1, %c0_2] : memref<9x50xbf16, #tpu.memory_space<vmem>>, vector<9x50xbf16>
    %cst = arith.constant dense<0.000000e+00> : vector<8x50xf32>
    %3 = tpu.matmul %1, %2, %cst {dimension_numbers = #tpu.dot_dimension_numbers<[1], [0], [0], [1], [0, 0, 1, 1], [], []>} : vector<8x9xbf16>, vector<9x50xbf16>, vector<8x50xf32> -> vector<8x50xf32>
    %c0_3 = arith.constant 0 : index
    %c0_4 = arith.constant 0 : index
    %4 = vector.load %arg3[%c0_3, %c0_4] : memref<1x50xf32, #tpu.memory_space<vmem>>, vector<1x50xf32>
    %5 = vector.broadcast %4 : vector<1x50xf32> to vector<8x50xf32>
    %6 = arith.addf %3, %5 : vector<8x50xf32>
    %7 = math.tanh %6 : vector<8x50xf32>
    %8 = arith.truncf %7 : vector<8x50xf32> to vector<8x50xbf16>
    %c0_5 = arith.constant 0 : index
    %c0_6 = arith.constant 0 : index
    %9 = vector.load %arg4[%c0_5, %c0_6] : memref<50x50xbf16, #tpu.memory_space<vmem>>, vector<50x50xbf16>
    %cst_7 = arith.constant dense<0.000000e+00> : vector<8x50xf32>
    %10 = tpu.matmul %8, %9, %cst_7 {dimension_numbers = #tpu.dot_dimension_numbers<[1], [0], [0], [1], [0, 0, 1, 1], [], []>} : vector<8x50xbf16>, vector<50x50xbf16>, vector<8x50xf32> -> vector<8x50xf32>
    %c0_8 = arith.constant 0 : index
    %c0_9 = arith.constant 0 : index
    %11 = vector.load %arg5[%c0_8, %c0_9] : memref<1x50xf32, #tpu.memory_space<vmem>>, vector<1x50xf32>
    %12 = vector.broadcast %11 : vector<1x50xf32> to vector<8x50xf32>
    %13 = arith.addf %10, %12 : vector<8x50xf32>
    %14 = math.tanh %13 : vector<8x50xf32>
    %15 = arith.truncf %14 : vector<8x50xf32> to vector<8x50xbf16>
    %c0_10 = arith.constant 0 : index
    %c0_11 = arith.constant 0 : index
    %16 = vector.load %arg6[%c0_10, %c0_11] : memref<50x9xbf16, #tpu.memory_space<vmem>>, vector<50x9xbf16>
    %cst_12 = arith.constant dense<0.000000e+00> : vector<8x9xf32>
    %17 = tpu.matmul %15, %16, %cst_12 {dimension_numbers = #tpu.dot_dimension_numbers<[1], [0], [0], [1], [0, 0, 1, 1], [], []>} : vector<8x50xbf16>, vector<50x9xbf16>, vector<8x9xf32> -> vector<8x9xf32>
    %c0_13 = arith.constant 0 : index
    %c0_14 = arith.constant 0 : index
    %18 = vector.load %arg7[%c0_13, %c0_14] : memref<1x9xf32, #tpu.memory_space<vmem>>, vector<1x9xf32>
    %19 = vector.broadcast %18 : vector<1x9xf32> to vector<8x9xf32>
    %20 = arith.addf %17, %19 : vector<8x9xf32>
    %c0_15 = arith.constant 0 : index
    %c0_16 = arith.constant 0 : index
    %21 = vector.load %arg8[%c0_15, %c0_16] : memref<8x9xf32, #tpu.memory_space<vmem>>, vector<8x9xf32>
    tpu.vector_store %arg8[%c0_15, %c0_16], %20 {strides = array<i32>} : memref<8x9xf32, #tpu.memory_space<vmem>>, vector<8x9xf32>,
    return
  }
  func.func @transform_0(%arg0: i32) -> (i32, i32) {
    %c0_i32 = arith.constant 0 : i32
    %c0_i32_0 = arith.constant 0 : i32
    return %arg0, %c0_i32 : i32, i32
  }
  func.func @transform_1(%arg0: i32) -> (i32, i32) {
    %c0_i32 = arith.constant 0 : i32
    %c0_i32_0 = arith.constant 0 : i32
    %c0_i32_1 = arith.constant 0 : i32
    return %c0_i32, %c0_i32_0 : i32, i32
  }
  func.func @transform_2(%arg0: i32) -> (i32, i32) {
    %c0_i32 = arith.constant 0 : i32
    %c0_i32_0 = arith.constant 0 : i32
    %c0_i32_1 = arith.constant 0 : i32
    return %c0_i32, %c0_i32_0 : i32, i32
  }
  func.func @transform_3(%arg0: i32) -> (i32, i32) {
    %c0_i32 = arith.constant 0 : i32
    %c0_i32_0 = arith.constant 0 : i32
    %c0_i32_1 = arith.constant 0 : i32
    return %c0_i32, %c0_i32_0 : i32, i32
  }
  func.func @transform_4(%arg0: i32) -> (i32, i32) {
    %c0_i32 = arith.constant 0 : i32
    %c0_i32_0 = arith.constant 0 : i32
    %c0_i32_1 = arith.constant 0 : i32
    return %c0_i32, %c0_i32_0 : i32, i32
  }
  func.func @transform_5(%arg0: i32) -> (i32, i32) {
    %c0_i32 = arith.constant 0 : i32
    %c0_i32_0 = arith.constant 0 : i32
    %c0_i32_1 = arith.constant 0 : i32
    return %c0_i32, %c0_i32_0 : i32, i32
  }
  func.func @transform_6(%arg0: i32) -> (i32, i32) {
    %c0_i32 = arith.constant 0 : i32
    %c0_i32_0 = arith.constant 0 : i32
    %c0_i32_1 = arith.constant 0 : i32
    return %c0_i32, %c0_i32_0 : i32, i32
  }
  func.func @transform_7(%arg0: i32) -> (i32, i32) {
    %c0_i32 = arith.constant 0 : i32
    %c0_i32_0 = arith.constant 0 : i32
    return %arg0, %c0_i32 : i32, i32
  }
}

</mosaic_0001>

<bundles_post_ra>
// kernel: tpu_custom_call.1
= control target key start
LH: loop header
LB: loop body
LE: loop exit
PB: predicated region body
PF: predicated region fallthrough
CT: control target
= control target key end

     0   :  { %12 = vsyncpa [#allocation3], 0  ;;  %s402_s0 = inlined_call_operand.vmem [shape: f32[8,9], index: 0, kind: input, shape index: {}]   ;;  %s403_s1 = inlined_call_operand.hbm [shape: bf16[9,50], index: 1, kind: input, shape index: {}]   ;;  %s404_s2 = inlined_call_operand.vmem [shape: f32[1,50], index: 2, kind: input, shape index: {}]   ;;  %s405_s3 = inlined_call_operand.vmem [shape: bf16[50,50], index: 3, kind: input, shape index: {}]   ;;  %s406_s4 = inlined_call_operand.vmem [shape: f32[1,50], index: 4, kind: input, shape index: {}]   ;;  %s407_s5 = inlined_call_operand.vmem [shape: bf16[50,9], index: 5, kind: input, shape index: {}]   ;;  %s408_s6 = inlined_call_operand.vmem [shape: f32[1,9], index: 6, kind: input, shape index: {}]   ;;  %s409_s7 = inlined_call_operand.hbm [shape: f32[8,9], index: 7, kind: output, shape index: {}]  }
   0x1   :  { %13 = vsyncpa [#allocation4], 0  ;;  %s20_s26 = sshll.u32 %s403_s1, 4  ;;  %s309_s27 = smov [#allocation2]   ;;  %s21_s26 = int_to_ptr.hbm [resolvable:$true] %s20_s26 }
   0x2   :  { %s22_s28 = sshll.u32 %s309_s27, 4  ;;  %s310_s29 = smov 64   ;;  %s23_s28 = int_to_ptr.vmem [resolvable:$true] %s22_s28 }
   0x3   :  { %s311_s30 = smov 4  }
   0x4   :  { %28 = dma.hbm_to_vmem [thread:$0]  %s21_s26, 128, %s23_s28, [#allocation3], %s310_s29, %s310_s29, %s311_s30  }
   0x5   :  { %305 = dma.done.wait [#allocation3], 128  }
   0x6   :  { %306 = vsyncadd [#allocation3], 4294967168  ;;  %vm61_vm0 = vcmask 1043456   ;;  %vm62_vm1 = vcmask 1044480   ;;  %v312_v0 = vmov 65535   ;;  %v44_v6 = vld [vmem:[%s402_s0] sm:$0xff] }
   0x7   :  { %v63_v1 = vsel %vm61_vm0, 4294967295, %v312_v0  ;;  %v209_v2 = vld [vmem:[#allocation2] sm:$0xf]  ;;  %v238_v3 = vld [vmem:[#allocation2] sm:$0x10]  ;;  %vm119_vm2 = vcmask 1040384   ;;  %v45_v10 = vpack.c.bf16 %v44_v6, %v44_v6 }
   0x8   :  { %v64_v4 = vsel %vm62_vm1, %v63_v1, 0  ;;  %v210_v5 = vor.u32 %v238_v3, %v209_v2  ;;  %v89_v7 = vld [vmem:[%s405_s3 + $0x18] sm:$0x1]  ;;  %vm57_vm3 = vcmask 72704   ;;  %v241_v13 = vld [vmem:[%s405_s3 + $0x10] sm:$0xff]  ;;  %v240_v14 = vld [vmem:[%s405_s3 + $0x8] sm:$0xff] }
   0x9   :  { %v107_v8 = vunpack.c.l.b16 %v89_v7  ;;  %v239_v15 = vld [vmem:[%s405_s3] sm:$0xff]  ;;  %v144_v16 = vld [vmem:[%s407_s5 + $0x18] sm:$0x1]  ;;  %vm115_vm4 = vcmask 408576   ;;  %v244_v26 = vld [vmem:[%s407_s5 + $0x10] sm:$0xff]  ;;  %s313_s28 = smov [#allocation5]  }
   0xa   :  { %v66_v9 = vand.u32 %v210_v5, %v64_v4  ;;  %v162_v17 = vunpack.c.l.b16 %v144_v16  ;;  %v250_v20 = vld [vmem:[%s404_s2] ss:$0 sm:$0xff]  ;;  %v243_v27 = vld [vmem:[%s407_s5 + $0x8] sm:$0xff]  ;;  %s195_s29 = sshll.u32 %s313_s28, 4  ;;  %s197_s8 = sshll.u32 %s409_s7, 4  ;;  %s196_s29 = int_to_ptr.vmem [resolvable:$true] %s195_s29  ;;  %s198_s8 = int_to_ptr.hbm [resolvable:$true] %s197_s8 }
   0xb   :  { %v111_v11 = vpack.c.b16 %v107_v8, %v107_v8  ;;  %v242_v28 = vld [vmem:[%s407_s5] sm:$0xff] }
   0xc   :  { %75 = vmatpush.bf16.msra.mxu0 %v66_v9  ;;  %v166_v18 = vpack.c.b16 %v162_v17, %v162_v17  ;;  %v251_v29 = vld [vmem:[%s406_s4] ss:$0 sm:$0xff] }
   0xd   :  { %v121_v12 = vsel %vm119_vm2, %v111_v11, 0  ;;  %v252_v35 = vld [vmem:[%s408_s6] ss:$0 sm:$0xff] }
   0xe   :  { %127 = vmatpush.bf16.msra.mxu1 %v121_v12  ;;  %v174_v19 = vsel %vm119_vm2, %v166_v18, 0 }
   0xf   :  { %211 = vmatmul.msk.bf16.vlgmr.msra.gmra.mxu0 %vm57_vm3, %v45_v10  ;;  %180 = vmatpush.bf16.msra.mxu2 %v174_v19 }
  0x12   :  { %128 = vmatpush.bf16.msra.mxu1 %v241_v13 }
  0x13   :  { %181 = vmatpush.bf16.msra.mxu2 %v244_v26 }
  0x16   :  { %129 = vmatpush.bf16.msra.mxu1 %v240_v14 }
  0x17   :  { %182 = vmatpush.bf16.msra.mxu2 %v243_v27 }
  0x1a   :  { %130 = vmatpush.bf16.msra.mxu1 %v239_v15 }
  0x1b   :  { %183 = vmatpush.bf16.msra.mxu2 %v242_v28 }
  0x8c   :  { %v77_v21 = vpop.f32.mrf.mxu0 }
  0x8d   :  { %v78_v22 = vadd.f32 %v250_v20, %v77_v21 }
  0x8f   :  { %253 = vtanh.f32 %v78_v22 }
  0x94   :  { %v79_v23 = vpop.f32.mrf.mxu0 }
  0x95   :  { %v254_v24 = vpop.eup %253 }
  0x96   :  { %v82_v25 = vpack.c.bf16 %v254_v24, %v254_v24 }
  0x98   :  { %224 = vmatmul.msk.bf16.vlgmr.msra.gmra.mxu1 %vm115_vm4, %v82_v25 }
 0x115   :  { %v132_v30 = vpop.f32.mrf.mxu1 }
 0x116   :  { %v133_v31 = vadd.f32 %v251_v29, %v132_v30 }
 0x118   :  { %255 = vtanh.f32 %v133_v31 }
 0x11d   :  { %v134_v32 = vpop.f32.mrf.mxu1 }
 0x11e   :  { %v256_v33 = vpop.eup %255 }
 0x11f   :  { %v137_v34 = vpack.c.bf16 %v256_v33, %v256_v33 }
 0x121   :  { %237 = vmatmul.msk.bf16.vlgmr.msra.gmra.mxu2 %vm115_vm4, %v137_v34 }
 0x1a4   :  { %v185_v36 = vpop.f32.mrf.mxu2 }
 0x1a5   :  { %v186_v37 = vadd.f32 %v252_v35, %v185_v36 }
 0x1a7   :  { %189 = vst.msk [vmem:[#allocation5] sm:$0xff] %vm57_vm3, %v186_v37 }
 0x1a8   :  { %200 = dma.vmem_to_hbm [thread:$0]  %s196_s29, 128, %s198_s8, [#allocation4]  }
 0x1ac   :  { %v187_v38 = vpop.f32.mrf.mxu2 }
 0x1ad   :  { %307 = dma.done.wait [#allocation4], 128  }
 0x1ae   :  { %308 = vsyncadd [#allocation4], 4294967168 }
 0x1af   :  { %205 = vsyncpa [#allocation3], 1 }
 0x1b0   :  { %206 = vsyncpa [#allocation4], 1 }

</bundles_post_ra>
